<compile_context>
chip_gen: v7x
topology: tpu7x:2x2x1
jax: 0.10.0
libtpu: 0.0.40
codegen_flags: <defaults>
</compile_context>

<pallas_src>
from functools import partial

import jax
import jax.numpy as jnp
from jax.experimental import pallas as pl
from jax.experimental.pallas import tpu as pltpu


# ----------------------------------------------------------------------------
# Kernels
# ----------------------------------------------------------------------------
def _generator_kernel(pooled_ref,   # [TB, H]  bf16  mean-pooled token embeddings
                      topic_ref,    # [TB, H]  bf16  topic embeddings
                      wp_ref,       # [H, H]   bf16  pooler dense
                      bp_ref,       # [1, H]   f32
                      w1a_ref,      # [H, H]   bf16  self.linear, comment half
                      w1b_ref,      # [H, H]   bf16  self.linear, topic half
                      b1_ref,       # [1, H]   f32
                      w2_ref,       # [H, Lp]  bf16  output layer (lane-padded)
                      b2_ref,       # [1, Lp]  f32   (-1e30 in padded lanes)
                      out_ref):     # [TB, Lp] f32   softmax probabilities
    # ---- BERT pooler stand-in: dense + tanh on the pre-pooled activation ----
    comment = jnp.tanh(
        jnp.dot(pooled_ref[...], wp_ref[...],
                preferred_element_type=jnp.float32) + bp_ref[...])        # [TB, H]

    # ---- concat([comment, topic], dim=1) @ W1 + b1 (W1 pre-split) -----------
    hidden = (jnp.dot(comment.astype(jnp.bfloat16), w1a_ref[...],
                      preferred_element_type=jnp.float32)
              + jnp.dot(topic_ref[...], w1b_ref[...],
                        preferred_element_type=jnp.float32)
              + b1_ref[...])                                              # [TB, H]

    # ---- output layer + softmax(dim=1) --------------------------------------
    logits = (jnp.dot(hidden.astype(jnp.bfloat16), w2_ref[...],
                      preferred_element_type=jnp.float32) + b2_ref[...])  # [TB, Lp]
    m = jnp.max(logits, axis=-1, keepdims=True)
    e = jnp.exp(logits - m)
    out_ref[...] = e / jnp.sum(e, axis=-1, keepdims=True)


def _generator_fold_kernel(pooled_ref,  # [TB, H]  bf16
                           topic_ref,   # [TB, H]  bf16
                           wp_ref,      # [H, H]   bf16  pooler dense
                           bp_ref,      # [1, H]   f32
                           w1af_ref,    # [H, Lp]  bf16  folded W1a @ W2
                           w1bf_ref,    # [H, Lp]  bf16  folded W1b @ W2
                           bf_ref,      # [1, Lp]  f32   b1 @ W2 + b2 (-1e30 pad)
                           out_ref):    # [TB, Lp] f32
    comment = jnp.tanh(
        jnp.dot(pooled_ref[...], wp_ref[...],
                preferred_element_type=jnp.float32) + bp_ref[...])        # [TB, H]

    # linear + output_layer folded offline (no nonlinearity between them).
    logits = (jnp.dot(comment.astype(jnp.bfloat16), w1af_ref[...],
                      preferred_element_type=jnp.float32)
              + jnp.dot(topic_ref[...], w1bf_ref[...],
                        preferred_element_type=jnp.float32)
              + bf_ref[...])                                              # [TB, Lp]
    m = jnp.max(logits, axis=-1, keepdims=True)
    e = jnp.exp(logits - m)
    out_ref[...] = e / jnp.sum(e, axis=-1, keepdims=True)


# ----------------------------------------------------------------------------
# Helpers
# ----------------------------------------------------------------------------
def _round_up(x, m):
    return ((x + m - 1) // m) * m


def _pick_tile(B):
    """Batch tile: multiple of 16 (bf16 sublane packing), <= 128, dividing the
    padded batch, and giving >= 2 grid steps when the padded batch allows (so
    v7x's two TensorCores both get work)."""
    Bp = _round_up(max(B, 1), 16)
    if Bp == 16:
        return 16, Bp
    tb = 16
    for t in range(16, min(Bp // 2, 128) + 1, 16):
        if Bp % t == 0:
            tb = t
    return tb, Bp


def prepare_params(params):
    """One-time weight preprocessing (bf16 casts, W1 split, optional W1->W2
    folding, lane padding).  Call once at init time, NOT per forward pass, so
    no weight-sized HBM traffic happens in the generation loop."""
    H = params["topic_emb"].shape[1]
    L = params["w2"].shape[1]
    Lp = _round_up(L, 128)

    prepared = {
        "token_emb": params["token_emb"].astype(jnp.float32),
        "topic_emb": params["topic_emb"].astype(jnp.float32),
        "wp": params["wp"].astype(jnp.bfloat16),
        "bp": params["bp"].astype(jnp.float32).reshape(1, H),
    }

    w1a = params["w1"][:H].astype(jnp.float32)       # comment half
    w1b = params["w1"][H:].astype(jnp.float32)       # topic half
    b1 = params["b1"].astype(jnp.float32).reshape(1, H)
    w2 = params["w2"].astype(jnp.float32)
    b2 = params["b2"].astype(jnp.float32).reshape(1, L)

    if Lp < 2 * H:
        # Fold self.linear into output_layer (flop win whenever Lp < 2H):
        #   logits = comment @ (W1a@W2) + topic @ (W1b@W2) + (b1@W2 + b2)
        # Folding is done in f32, then cast to bf16.  Padded lanes: zero weight
        # columns + -1e30 bias so exp() underflows to exactly 0 in softmax.
        prepared["w1af"] = jnp.zeros((H, Lp), jnp.bfloat16).at[:, :L].set(
            (w1a @ w2).astype(jnp.bfloat16))
        prepared["w1bf"] = jnp.zeros((H, Lp), jnp.bfloat16).at[:, :L].set(
            (w1b @ w2).astype(jnp.bfloat16))
        prepared["bf"] = jnp.full((1, Lp), -1e30, jnp.float32).at[:, :L].set(
            b1 @ w2 + b2)
    else:
        prepared["w1a"] = w1a.astype(jnp.bfloat16)
        prepared["w1b"] = w1b.astype(jnp.bfloat16)
        prepared["b1"] = b1
        prepared["w2"] = jnp.zeros((H, Lp), jnp.bfloat16).at[:, :L].set(
            w2.astype(jnp.bfloat16))
        prepared["b2"] = jnp.full((1, Lp), -1e30, jnp.float32).at[:, :L].set(b2)
    return prepared


# ----------------------------------------------------------------------------
# Forward pass
# ----------------------------------------------------------------------------
@partial(jax.jit, static_argnames=("max_length",))
def generator_forward(input_ids, topic_ids, prepared, *, max_length):
    """input_ids: [B, 1, S] or [B, S] int32; topic_ids: [B] int32.
    Returns softmax probabilities [B, max_length] (f32)."""
    # torch does .squeeze(); squeeze only the middle axis so a [1,1,1] input
    # does not collapse to 0-d.
    if input_ids.ndim == 3:
        input_ids = jnp.squeeze(input_ids, axis=1)
    elif input_ids.ndim == 1:
        input_ids = input_ids[None, :]

    # Embedding gathers + mean pool stay in plain JAX (XLA fuses gather+reduce);
    # only the pooled [B, H] activation crosses the kernel boundary.
    tok_emb = jnp.take(prepared["token_emb"], input_ids, axis=0)    # [B, S, H]
    pooled = jnp.mean(tok_emb, axis=1)                              # [B, H]
    topic_emb = jnp.take(prepared["topic_emb"], topic_ids, axis=0)  # [B, H]

    B, H = pooled.shape
    folded = "w1af" in prepared
    Lp = (prepared["w1af"] if folded else prepared["w2"]).shape[1]
    L = max_length

    TB, Bp = _pick_tile(B)

    pooled_p = jnp.zeros((Bp, H), jnp.bfloat16).at[:B].set(
        pooled.astype(jnp.bfloat16))
    topic_p = jnp.zeros((Bp, H), jnp.bfloat16).at[:B].set(
        topic_emb.astype(jnp.bfloat16))

    act_spec = pl.BlockSpec((TB, H), lambda i: (i, 0))

    def resident(shape):          # weights/biases: same block every grid step
        return pl.BlockSpec(shape, lambda i: (0, 0))

    if folded:
        kernel = _generator_fold_kernel
        weight_args = (prepared["wp"], prepared["bp"],
                       prepared["w1af"], prepared["w1bf"], prepared["bf"])
        weight_specs = [resident((H, H)), resident((1, H)),
                        resident((H, Lp)), resident((H, Lp)),
                        resident((1, Lp))]
        flops = 2 * Bp * H * (H + 2 * Lp)
    else:
        kernel = _generator_kernel
        weight_args = (prepared["wp"], prepared["bp"],
                       prepared["w1a"], prepared["w1b"], prepared["b1"],
                       prepared["w2"], prepared["b2"])
        weight_specs = [resident((H, H)), resident((1, H)),
                        resident((H, H)), resident((H, H)), resident((1, H)),
                        resident((H, Lp)), resident((1, Lp))]
        flops = 2 * Bp * H * (3 * H + Lp)

    bytes_accessed = (sum(int(a.size) * a.dtype.itemsize for a in weight_args)
                      + (pooled_p.size + topic_p.size) * 2
                      + Bp * Lp * 4)
    cost = pl.CostEstimate(flops=int(flops),
                           transcendentals=int(Bp * (H + Lp)),
                           bytes_accessed=int(bytes_accessed))

    out_p = pl.pallas_call(
        kernel,
        out_shape=jax.ShapeDtypeStruct((Bp, Lp), jnp.float32),
        grid=(Bp // TB,),
        in_specs=[act_spec, act_spec] + weight_specs,
        out_specs=pl.BlockSpec((TB, Lp), lambda i: (i, 0)),
        compiler_params=pltpu.CompilerParams(
            dimension_semantics=("parallel",),
            vmem_limit_bytes=32 * 1024 * 1024),
        cost_estimate=cost,
    )(pooled_p, topic_p, *weight_args)

    return out_p[:B, :L]


# ----------------------------------------------------------------------------
# Reference (plain JAX, f32) and parameter init
# ----------------------------------------------------------------------------
def reference_forward(input_ids, topic_ids, params):
    if input_ids.ndim == 3:
        input_ids = jnp.squeeze(input_ids, axis=1)
    elif input_ids.ndim == 1:
        input_ids = input_ids[None, :]
    tok = jnp.take(params["token_emb"], input_ids, axis=0)
    pooled = jnp.mean(tok, axis=1)
    comment = jnp.tanh(pooled @ params["wp"] + params["bp"])
    topic = jnp.take(params["topic_emb"], topic_ids, axis=0)
    concat = jnp.concatenate([comment, topic], axis=1)
    hidden = concat @ params["w1"] + params["b1"]
    logits = hidden @ params["w2"] + params["b2"]
    return jax.nn.softmax(logits, axis=1)


def init_params(key, vocab_size, hidden_size, num_topics, max_length):
    ks = jax.random.split(key, 8)
    s = 0.02
    return {
        "token_emb": s * jax.random.normal(ks[0], (vocab_size, hidden_size), jnp.float32),
        "topic_emb": s * jax.random.normal(ks[1], (num_topics, hidden_size), jnp.float32),
        "wp": s * jax.random.normal(ks[2], (hidden_size, hidden_size), jnp.float32),
        "bp": jnp.zeros((1, hidden_size), jnp.float32),
        "w1": s * jax.random.normal(ks[3], (2 * hidden_size, hidden_size), jnp.float32),
        "b1": s * jax.random.normal(ks[4], (1, hidden_size), jnp.float32),
        "w2": s * jax.random.normal(ks[5], (hidden_size, max_length), jnp.float32),
        "b2": s * jax.random.normal(ks[6], (1, max_length), jnp.float32),
    }


if __name__ == "__main__":
    def run_case(key, B, S, hidden, num_topics, max_length, vocab):
        kp, ki, kt = jax.random.split(key, 3)
        params = init_params(kp, vocab, hidden, num_topics, max_length)
        prepared = prepare_params(params)          # one-time weight prep
        input_ids = jax.random.randint(ki, (B, 1, S), 0, vocab, dtype=jnp.int32)
        topic_ids = jax.random.randint(kt, (B,), 0, num_topics, dtype=jnp.int32)

        probs = generator_forward(input_ids, topic_ids, prepared,
                                  max_length=max_length)
        jax.block_until_ready(probs)

        assert probs.shape == (B, max_length)
        assert bool(jnp.allclose(jnp.sum(probs, axis=1), 1.0, atol=1e-3))
        ref = reference_forward(input_ids, topic_ids, params)
        # bf16 weights/activations vs f32 reference -> small drift expected.
        assert bool(jnp.allclose(probs, ref, atol=3e-2))

    key = jax.random.PRNGKey(0)
    k1, k2 = jax.random.split(key)
    # Small shapes; exercises the unfolded path (Lp >= 2H).
    run_case(k1, B=2, S=8, hidden=32, num_topics=4, max_length=16, vocab=50)
    # Exercises the folded-weight path (Lp < 2H).
    run_case(k2, B=2, S=8, hidden=128, num_topics=4, max_length=16, vocab=50)

    print("KERNEL_OK")
</pallas_src>

<mosaic_0001>
module attributes {stable_mosaic.version = 11 : i64} {
  func.func @_generator_kernel(%arg0: i32, %arg1: memref<16x32xbf16, #tpu.memory_space<vmem>>, %arg2: memref<16x32xbf16, #tpu.memory_space<vmem>>, %arg3: memref<32x32xbf16, #tpu.memory_space<vmem>>, %arg4: memref<1x32xf32, #tpu.memory_space<vmem>>, %arg5: memref<32x32xbf16, #tpu.memory_space<vmem>>, %arg6: memref<32x32xbf16, #tpu.memory_space<vmem>>, %arg7: memref<1x32xf32, #tpu.memory_space<vmem>>, %arg8: memref<32x128xbf16, #tpu.memory_space<vmem>>, %arg9: memref<1x128xf32, #tpu.memory_space<vmem>>, %arg10: memref<16x128xf32, #tpu.memory_space<vmem>>) attributes {dimension_semantics = [#tpu.dimension_semantics<parallel>], iteration_bounds = array<i64: 1>, scalar_prefetch = 0 : i64, scratch_operands = 0 : i64, tpu.core_type = #tpu.core_type<tc>, window_params = [{transform_indices = @transform_0, window_bounds = array<i64: 16, 32>}, {transform_indices = @transform_1, window_bounds = array<i64: 16, 32>}, {pipeline_mode = #tpu.pipeline_mode<synchronous>, transform_indices = @transform_2, window_bounds = array<i64: 32, 32>}, {pipeline_mode = #tpu.pipeline_mode<synchronous>, transform_indices = @transform_3, window_bounds = array<i64: 1, 32>}, {pipeline_mode = #tpu.pipeline_mode<synchronous>, transform_indices = @transform_4, window_bounds = array<i64: 32, 32>}, {pipeline_mode = #tpu.pipeline_mode<synchronous>, transform_indices = @transform_5, window_bounds = array<i64: 32, 32>}, {pipeline_mode = #tpu.pipeline_mode<synchronous>, transform_indices = @transform_6, window_bounds = array<i64: 1, 32>}, {pipeline_mode = #tpu.pipeline_mode<synchronous>, transform_indices = @transform_7, window_bounds = array<i64: 32, 128>}, {pipeline_mode = #tpu.pipeline_mode<synchronous>, transform_indices = @transform_8, window_bounds = array<i64: 1, 128>}, {transform_indices = @transform_9, window_bounds = array<i64: 16, 128>}]} {
    %c0 = arith.constant 0 : index
    %c0_0 = arith.constant 0 : index
    %0 = vector.load %arg1[%c0, %c0_0] : memref<16x32xbf16, #tpu.memory_space<vmem>>, vector<16x32xbf16>
    %c0_1 = arith.constant 0 : index
    %c0_2 = arith.constant 0 : index
    %1 = vector.load %arg3[%c0_1, %c0_2] : memref<32x32xbf16, #tpu.memory_space<vmem>>, vector<32x32xbf16>
    %cst = arith.constant dense<0.000000e+00> : vector<16x32xf32>
    %2 = tpu.matmul %0, %1, %cst {dimension_numbers = #tpu.dot_dimension_numbers<[1], [0], [0], [1], [0, 0, 1, 1], [], []>} : vector<16x32xbf16>, vector<32x32xbf16>, vector<16x32xf32> -> vector<16x32xf32>
    %c0_3 = arith.constant 0 : index
    %c0_4 = arith.constant 0 : index
    %3 = vector.load %arg4[%c0_3, %c0_4] : memref<1x32xf32, #tpu.memory_space<vmem>>, vector<1x32xf32>
    %4 = vector.broadcast %3 : vector<1x32xf32> to vector<16x32xf32>
    %5 = arith.addf %2, %4 : vector<16x32xf32>
    %6 = math.tanh %5 : vector<16x32xf32>
    %7 = arith.truncf %6 : vector<16x32xf32> to vector<16x32xbf16>
    %c0_5 = arith.constant 0 : index
    %c0_6 = arith.constant 0 : index
    %8 = vector.load %arg5[%c0_5, %c0_6] : memref<32x32xbf16, #tpu.memory_space<vmem>>, vector<32x32xbf16>
    %cst_7 = arith.constant dense<0.000000e+00> : vector<16x32xf32>
    %9 = tpu.matmul %7, %8, %cst_7 {dimension_numbers = #tpu.dot_dimension_numbers<[1], [0], [0], [1], [0, 0, 1, 1], [], []>} : vector<16x32xbf16>, vector<32x32xbf16>, vector<16x32xf32> -> vector<16x32xf32>
    %c0_8 = arith.constant 0 : index
    %c0_9 = arith.constant 0 : index
    %10 = vector.load %arg2[%c0_8, %c0_9] : memref<16x32xbf16, #tpu.memory_space<vmem>>, vector<16x32xbf16>
    %c0_10 = arith.constant 0 : index
    %c0_11 = arith.constant 0 : index
    %11 = vector.load %arg6[%c0_10, %c0_11] : memref<32x32xbf16, #tpu.memory_space<vmem>>, vector<32x32xbf16>
    %cst_12 = arith.constant dense<0.000000e+00> : vector<16x32xf32>
    %12 = tpu.matmul %10, %11, %cst_12 {dimension_numbers = #tpu.dot_dimension_numbers<[1], [0], [0], [1], [0, 0, 1, 1], [], []>} : vector<16x32xbf16>, vector<32x32xbf16>, vector<16x32xf32> -> vector<16x32xf32>
    %13 = arith.addf %9, %12 : vector<16x32xf32>
    %c0_13 = arith.constant 0 : index
    %c0_14 = arith.constant 0 : index
    %14 = vector.load %arg7[%c0_13, %c0_14] : memref<1x32xf32, #tpu.memory_space<vmem>>, vector<1x32xf32>
    %15 = vector.broadcast %14 : vector<1x32xf32> to vector<16x32xf32>
    %16 = arith.addf %13, %15 : vector<16x32xf32>
    %17 = arith.truncf %16 : vector<16x32xf32> to vector<16x32xbf16>
    %c0_15 = arith.constant 0 : index
    %c0_16 = arith.constant 0 : index
    %18 = vector.load %arg8[%c0_15, %c0_16] : memref<32x128xbf16, #tpu.memory_space<vmem>>, vector<32x128xbf16>
    %cst_17 = arith.constant dense<0.000000e+00> : vector<16x128xf32>
    %19 = tpu.matmul %17, %18, %cst_17 {dimension_numbers = #tpu.dot_dimension_numbers<[1], [0], [0], [1], [0, 0, 1, 1], [], []>} : vector<16x32xbf16>, vector<32x128xbf16>, vector<16x128xf32> -> vector<16x128xf32>
    %c0_18 = arith.constant 0 : index
    %c0_19 = arith.constant 0 : index
    %20 = vector.load %arg9[%c0_18, %c0_19] : memref<1x128xf32, #tpu.memory_space<vmem>>, vector<1x128xf32>
    %21 = vector.broadcast %20 : vector<1x128xf32> to vector<16x128xf32>
    %22 = arith.addf %19, %21 : vector<16x128xf32>
    %cst_20 = arith.constant dense<0xFF800000> : vector<16xf32>
    %23 = vector.multi_reduction <maximumf>, %22, %cst_20 [1] : vector<16x128xf32> to vector<16xf32>
    %24 = vector.shape_cast %23 : vector<16xf32> to vector<16x1xf32>
    %25 = vector.broadcast %24 : vector<16x1xf32> to vector<16x128xf32>
    %26 = arith.subf %22, %25 : vector<16x128xf32>
    %27 = math.exp %26 : vector<16x128xf32>
    %cst_21 = arith.constant dense<0.000000e+00> : vector<16xf32>
    %28 = vector.multi_reduction <add>, %27, %cst_21 [1] : vector<16x128xf32> to vector<16xf32>
    %29 = vector.shape_cast %28 : vector<16xf32> to vector<16x1xf32>
    %30 = vector.broadcast %29 : vector<16x1xf32> to vector<16x128xf32>
    %31 = arith.divf %27, %30 : vector<16x128xf32>
    %c0_22 = arith.constant 0 : index
    %c0_23 = arith.constant 0 : index
    %32 = vector.load %arg10[%c0_22, %c0_23] : memref<16x128xf32, #tpu.memory_space<vmem>>, vector<16x128xf32>
    tpu.vector_store %arg10[%c0_22, %c0_23], %31 {strides = array<i32>} : memref<16x128xf32, #tpu.memory_space<vmem>>, vector<16x128xf32>,
    return
  }
  func.func @transform_0(%arg0: i32) -> (i32, i32) {
    %c0_i32 = arith.constant 0 : i32
    %c0_i32_0 = arith.constant 0 : i32
    return %arg0, %c0_i32 : i32, i32
  }
  func.func @transform_1(%arg0: i32) -> (i32, i32) {
    %c0_i32 = arith.constant 0 : i32
    %c0_i32_0 = arith.constant 0 : i32
    return %arg0, %c0_i32 : i32, i32
  }
  func.func @transform_2(%arg0: i32) -> (i32, i32) {
    %c0_i32 = arith.constant 0 : i32
    %c0_i32_0 = arith.constant 0 : i32
    %c0_i32_1 = arith.constant 0 : i32
    return %c0_i32, %c0_i32_0 : i32, i32
  }
  func.func @transform_3(%arg0: i32) -> (i32, i32) {
    %c0_i32 = arith.constant 0 : i32
    %c0_i32_0 = arith.constant 0 : i32
    %c0_i32_1 = arith.constant 0 : i32
    return %c0_i32, %c0_i32_0 : i32, i32
  }
  func.func @transform_4(%arg0: i32) -> (i32, i32) {
    %c0_i32 = arith.constant 0 : i32
    %c0_i32_0 = arith.constant 0 : i32
    %c0_i32_1 = arith.constant 0 : i32
    return %c0_i32, %c0_i32_0 : i32, i32
  }
  func.func @transform_5(%arg0: i32) -> (i32, i32) {
    %c0_i32 = arith.constant 0 : i32
    %c0_i32_0 = arith.constant 0 : i32
    %c0_i32_1 = arith.constant 0 : i32
    return %c0_i32, %c0_i32_0 : i32, i32
  }
  func.func @transform_6(%arg0: i32) -> (i32, i32) {
    %c0_i32 = arith.constant 0 : i32
    %c0_i32_0 = arith.constant 0 : i32
    %c0_i32_1 = arith.constant 0 : i32
    return %c0_i32, %c0_i32_0 : i32, i32
  }
  func.func @transform_7(%arg0: i32) -> (i32, i32) {
    %c0_i32 = arith.constant 0 : i32
    %c0_i32_0 = arith.constant 0 : i32
    %c0_i32_1 = arith.constant 0 : i32
    return %c0_i32, %c0_i32_0 : i32, i32
  }
  func.func @transform_8(%arg0: i32) -> (i32, i32) {
    %c0_i32 = arith.constant 0 : i32
    %c0_i32_0 = arith.constant 0 : i32
    %c0_i32_1 = arith.constant 0 : i32
    return %c0_i32, %c0_i32_0 : i32, i32
  }
  func.func @transform_9(%arg0: i32) -> (i32, i32) {
    %c0_i32 = arith.constant 0 : i32
    %c0_i32_0 = arith.constant 0 : i32
    return %arg0, %c0_i32 : i32, i32
  }
}

</mosaic_0001>

<bundles_post_ra>
// kernel: generator_forward.1
= control target key start
LH: loop header
LB: loop body
LE: loop exit
PB: predicated region body
PF: predicated region fallthrough
CT: control target
= control target key end

     0   :  { %v424_v0 = vmov 0.0   ;;  %vm425_vm0 = vmmov 0   ;;  %vm63_vm1 = vcmask 261120   ;;  %s529_s2 = inlined_call_operand.vmem [shape: bf16[32,32], index: 2, kind: input, shape index: {}]   ;;  %s530_s0 = inlined_call_operand.vmem [shape: bf16[16,32], index: 0, kind: input, shape index: {}]   ;;  %s531_s5 = inlined_call_operand.vmem [shape: bf16[32,32], index: 5, kind: input, shape index: {}]   ;;  %s532_s4 = inlined_call_operand.vmem [shape: bf16[32,32], index: 4, kind: input, shape index: {}]   ;;  %s533_s1 = inlined_call_operand.vmem [shape: bf16[16,32], index: 1, kind: input, shape index: {}]   ;;  %s534_s3 = inlined_call_operand.vmem [shape: f32[1,32], index: 3, kind: input, shape index: {}]   ;;  %s535_s7 = inlined_call_operand.vmem [shape: bf16[32,128], index: 7, kind: input, shape index: {}]   ;;  %s536_s6 = inlined_call_operand.vmem [shape: f32[1,32], index: 6, kind: input, shape index: {}]   ;;  %s537_s8 = inlined_call_operand.vmem [shape: f32[1,128], index: 8, kind: input, shape index: {}]   ;;  %s538_s9 = inlined_call_operand.vmem [shape: f32[16,128], index: 9, kind: output, shape index: {}]  }
   0x1   :  { %368 = vmatprep.subr.bf16.mxu0 %v424_v0  ;;  %v402_v1 = vld [vmem:[%s529_s2] sm:$0xff]   ;;  %372 = vmatprep.mubr.msk.bf16.mxu0 %vm425_vm0, %v424_v0  ;;  %v403_v2 = vld [vmem:[%s529_s2 + $0x8] sm:$0xff]  }
   0x2   :  { %376 = vmatprep.subr.bf16.mxu1 %v424_v0  ;;  %380 = vmatprep.mubr.msk.bf16.mxu1 %vm425_vm0, %v424_v0  ;;  %v404_v3 = vld [vmem:[%s530_s0] sm:$0xff]   ;;  %v407_v6 = vld [vmem:[%s531_s5 + $0x8] sm:$0xff]  }
   0x3   :  { %369 = vmatpush3.bf16.msra.mxu0 %v402_v1  ;;  %v405_v4 = vld [vmem:[%s531_s5] sm:$0xff]   ;;  %v408_v7 = vld [vmem:[%s532_s4 + $0x8] sm:$0xff]  }
   0x4   :  { %370 = vmatprep.subr.bf16.mxu0 %v424_v0  ;;  %v406_v5 = vld [vmem:[%s532_s4] sm:$0xff]   ;;  %377 = vmatpush3.bf16.msra.mxu1 %v405_v4  ;;  %v411_v24 = vld [vmem:[%s535_s7 + $0x8] sm:$0xff]  }
   0x5   :  { %378 = vmatprep.subr.bf16.mxu1 %v424_v0  ;;  %v409_v8 = vld [vmem:[%s533_s1] sm:$0xff]  }
   0x6   :  { %v339_v9 = vld [vmem:[%s534_s3] ss:$0 sm:$0xff] }
   0x7   :  { %371 = vmatpush3.bf16.msra.mxu0 %v403_v2  ;;  %v410_v23 = vld [vmem:[%s535_s7] sm:$0xff]  }
   0x8   :  { %384 = vmatprep.subr.bf16.mxu0 %v424_v0  ;;  %379 = vmatpush3.bf16.msra.mxu1 %v407_v6  ;;  %v351_v28 = vld [vmem:[%s536_s6] ss:$0 sm:$0xff] }
   0x9   :  { %392 = vmatprep.subr.bf16.mxu1 %v424_v0  ;;  %v352_v35 = vld [vmem:[%s537_s8] ss:$0 sm:$0xff] }
   0xa   :  { %373 = vmatmul.mubr.msk.bf16.vlgmr.msra.gmra.mrb[0].mxu0 %vm63_vm1, %v404_v3 }
   0xb   :  { %388 = vmatprep.mubr.msk.bf16.mxu0 %vm425_vm0, %v424_v0  ;;  %385 = vmatpush3.bf16.msra.mxu0 %v406_v5 }
   0xc   :  { %386 = vmatprep.subr.bf16.mxu0 %v424_v0  ;;  %381 = vmatmul.mubr.msk.bf16.vlgmr.msra.gmra.mrb[0].mxu1 %vm63_vm1, %v409_v8 }
   0xd   :  { %396 = vmatprep.mubr.msk.bf16.mxu1 %vm425_vm0, %v424_v0  ;;  %393 = vmatpush3.bf16.msra.mxu1 %v410_v23 }
   0xe   :  { %394 = vmatprep.subr.bf16.mxu1 %v424_v0 }
   0xf   :  { %387 = vmatpush3.bf16.msra.mxu0 %v408_v7 }
  0x11   :  { %395 = vmatpush3.bf16.msra.mxu1 %v411_v24 }
  0xdd   :  { %v101_v10 = vpop.f32.mrb[0].mxu0 }
  0xde   :  { %v102_v11 = vadd.f32 %v339_v9, %v101_v10  ;;  %v374_v12 = vpop.f32.mrb[1].mxu0 }
  0xdf   :  { %v104_v13 = vpop.f32.mrb[2].mxu0  ;;  %v175_v19 = vpop.f32.mrb[0].mxu1 }
  0xe0   :  { %v105_v14 = vadd.f32 %v339_v9, %v104_v13  ;;  %v375_v15 = vpop.f32.mrb[3].mxu0  ;;  %412 = vtanh.f32 %v102_v11  ;;  %v382_v20 = vpop.f32.mrb[1].mxu1 }
  0xe1   :  { %v178_v21 = vpop.f32.mrb[2].mxu1 }
  0xe2   :  { %414 = vtanh.f32 %v105_v14  ;;  %v383_v22 = vpop.f32.mrb[3].mxu1 }
  0xea   :  { %v413_v16 = vpop.eup %412 }
  0xec   :  { %v415_v17 = vpop.eup %414 }
  0xed   :  { %v110_v18 = vpack.c.bf16 %v415_v17, %v413_v16 }
  0xef   :  { %389 = vmatmul.mubr.msk.bf16.vlgmr.msra.gmra.mrb[4].mxu0 %vm63_vm1, %v110_v18 }
 0x1c2   :  { %v231_v25 = vpop.f32.mrb[4].mxu0 }
 0x1c3   :  { %v232_v26 = vadd.f32 %v231_v25, %v175_v19  ;;  %v390_v27 = vpop.f32.mrb[5].mxu0 }
 0x1c4   :  { %v234_v29 = vpop.f32.mrb[6].mxu0 }
 0x1c5   :  { %v235_v30 = vadd.f32 %v234_v29, %v178_v21  ;;  %v391_v31 = vpop.f32.mrb[7].mxu0  ;;  %v245_v32 = vadd.f32 %v351_v28, %v232_v26 }
 0x1c7   :  { %v246_v33 = vadd.f32 %v351_v28, %v235_v30 }
 0x1c9   :  { %v247_v34 = vpack.c.bf16 %v246_v33, %v245_v32 }
 0x1cb   :  { %397 = vmatmul.mubr.msk.bf16.vlgmr.msra.gmra.mrb[4].mxu1 %vm63_vm1, %v247_v34 }
 0x29e   :  { %v308_v36 = vpop.f32.mrb[4].mxu1 }
 0x29f   :  { %v309_v37 = vadd.f32 %v352_v35, %v308_v36  ;;  %v398_v38 = vpop.f32.mrb[5].mxu1 }
 0x2a0   :  { %v311_v39 = vpop.f32.mrb[6].mxu1 }
 0x2a1   :  { %315 = vmax.xlane.f32.xlu0 %v309_v37  ;;  %v399_v40 = vpop.f32.mrb[7].mxu1  ;;  %v312_v41 = vadd.f32 %v352_v35, %v311_v39 }
 0x2a5   :  { %317 = vmax.xlane.f32.xlu0 %v312_v41 }
 0x32e   :  { %v316_v42 = vpop.xlane.xlu0 %315 }
 0x32f   :  { %v319_v43 = vsub.f32 %v309_v37, %v316_v42 }
 0x331   :  { %v321_v44 = vmul.f32 1.442695, %v319_v43 }
 0x332   :  { %v318_v45 = vpop.xlane.xlu0 %317 }
 0x333   :  { %416 = vpow2.f32 %v321_v44  ;;  %v320_v46 = vsub.f32 %v312_v41, %v318_v45 }
 0x335   :  { %v323_v47 = vmul.f32 1.442695, %v320_v46 }
 0x337   :  { %418 = vpow2.f32 %v323_v47 }
 0x33d   :  { %v417_v48 = vpop.eup %416 }
 0x33e   :  { %325 = vadd.xlane.f32.xlu1 %v417_v48 }
 0x341   :  { %v419_v49 = vpop.eup %418 }
 0x342   :  { %327 = vadd.xlane.f32.xlu1 %v419_v49 }
 0x3cb   :  { %v326_v50 = vpop.xlane.xlu1 %325 }
 0x3cc   :  { %420 = vrcp.f32 %v326_v50 }
 0x3cf   :  { %v328_v51 = vpop.xlane.xlu1 %327 }
 0x3d0   :  { %422 = vrcp.f32 %v328_v51 }
 0x3d6   :  { %v421_v52 = vpop.eup %420 }
 0x3d7   :  { %v330_v53 = vmul.f32 %v421_v52, %v417_v48 }
 0x3d9   :  { %333 = vst [vmem:[%s538_s9] sm:$0xff] %v330_v53 }
 0x3da   :  { %v423_v54 = vpop.eup %422 }
 0x3db   :  { %v332_v55 = vmul.f32 %v423_v54, %v419_v49 }
 0x3dd   :  { %334 = vst [vmem:[%s538_s9 + $0x8] sm:$0xff] %v332_v55 }

</bundles_post_ra>
